<compile_context>
chip_gen: v6e
topology: v6e:2x2x1
jax: 0.10.0
libtpu: 0.0.40
codegen_flags: <defaults>
</compile_context>

<pallas_src>
import functools

import jax
import jax.numpy as jnp
from jax.experimental import pallas as pl
from jax.experimental.pallas import tpu as pltpu


def _round_up(x, m):
    return (x + m - 1) // m * m


def _patch_embed_kernel(x_ref, w_ref, b_ref, g_ref, beta_ref, o_ref, *, eps):
    # x_ref: (TN, K) bf16, w_ref: (K, E) bf16, b/g/beta: (1, E) f32,
    # o_ref: (TN, E).
    # Patchified strided conv == matmul on the MXU (bf16 in, f32 accumulate).
    y = jnp.dot(x_ref[...], w_ref[...], preferred_element_type=jnp.float32)
    y = y + b_ref[...]                              # conv bias, f32

    # LayerNorm over the (unpadded) embed dim; matches torch.nn.LayerNorm
    # (biased variance, eps inside the sqrt).
    e = y.shape[-1]
    inv_e = jnp.float32(1.0 / e)
    mean = jnp.sum(y, axis=-1, keepdims=True) * inv_e
    d = y - mean
    var = jnp.sum(d * d, axis=-1, keepdims=True) * inv_e
    y_hat = d * jax.lax.rsqrt(var + jnp.float32(eps))
    o_ref[...] = (y_hat * g_ref[...] + beta_ref[...]).astype(o_ref.dtype)


def _pick_token_tile(n, bytes_per_row, *, vmem_budget=10 << 20, max_tokens=4096):
    """Pick (TN, N_pad): token rows per grid step and padded token count.

    Prefers TN == N (single step, full-dim block -> always a legal BlockSpec)
    or an exact multiple-of-8 divisor of N (no padded rows).  Falls back to
    padding the token axis only when no suitable divisor exists.
    """
    cap = min(max_tokens, max(8, vmem_budget // max(bytes_per_row, 1)))
    if n <= cap:
        return n, n
    d = (cap // 8) * 8
    while d >= 8:
        if n % d == 0:
            return d, n
        d -= 8
    tn = max((cap // 8) * 8, 8)
    return tn, _round_up(n, tn)


def patch_embed_pallas(x, conv_w, conv_b, ln_w, ln_b, patch_size, *,
                       eps=1e-5, out_dtype=None, max_tokens=4096):
    """x: (B, H, W, C).  conv_w: (E, C, ph, pw); conv_b/ln_w/ln_b: (E,)."""
    B, H, W, C = x.shape
    ph, pw = patch_size
    E = conv_w.shape[0]
    Hp, Wp = H // ph, W // pw
    N = B * Hp * Wp
    K = ph * pw * C
    out_dtype = out_dtype or x.dtype
    out_itemsize = jnp.dtype(out_dtype).itemsize

    # Double-buffered input + output bytes per token row -> token tile size.
    bytes_per_row = 2 * (K * 2) + 2 * (E * out_itemsize)
    TN, N_pad = _pick_token_tile(N, bytes_per_row, max_tokens=max_tokens)

    # --- glue: extract non-overlapping patches, flatten in (r, s, c) order ---
    # Cast to bf16 in the same XLA op: feeds the MXU directly and halves the
    # HBM bytes of the patchified copy.
    # TODO(synk): move patch extraction into the kernel to drop this round trip.
    xp = x.reshape(B, Hp, ph, Wp, pw, C)
    xp = xp.transpose(0, 1, 3, 2, 4, 5).reshape(N, K).astype(jnp.bfloat16)
    if N_pad != N:
        xp = jnp.pad(xp, ((0, N_pad - N), (0, 0)))

    # --- glue: conv weight -> (K, E) bf16; bias/LN params -> (1, E) f32 ---
    wf = conv_w.transpose(2, 3, 1, 0).reshape(K, E).astype(jnp.bfloat16)
    b2 = conv_b.reshape(1, E).astype(jnp.float32)
    g2 = ln_w.reshape(1, E).astype(jnp.float32)
    beta2 = ln_b.reshape(1, E).astype(jnp.float32)

    grid = (N_pad // TN,)
    kernel = functools.partial(_patch_embed_kernel, eps=eps)

    cost = pl.CostEstimate(
        flops=2 * N_pad * K * E,
        transcendentals=0,
        bytes_accessed=(N_pad * K * 2 + K * E * 2 + 3 * E * 4
                        + N_pad * E * out_itemsize),
    )

    out = pl.pallas_call(
        kernel,
        out_shape=jax.ShapeDtypeStruct((N_pad, E), out_dtype),
        grid_spec=pltpu.PrefetchScalarGridSpec(
            num_scalar_prefetch=0,
            grid=grid,
            in_specs=[
                pl.BlockSpec((TN, K), lambda i: (i, 0)),   # streamed token rows
                pl.BlockSpec((K, E), lambda i: (0, 0)),    # resident weight
                pl.BlockSpec((1, E), lambda i: (0, 0)),    # resident conv bias
                pl.BlockSpec((1, E), lambda i: (0, 0)),    # resident LN gamma
                pl.BlockSpec((1, E), lambda i: (0, 0)),    # resident LN beta
            ],
            out_specs=pl.BlockSpec((TN, E), lambda i: (i, 0)),
        ),
        compiler_params=pltpu.CompilerParams(
            dimension_semantics=("parallel",)),
        cost_estimate=cost,
    )(xp, wf, b2, g2, beta2)

    if N_pad != N:
        out = out[:N]
    return out.reshape(B, Hp, Wp, E)


def patch_embed_reference(x, conv_w, conv_b, ln_w, ln_b, patch_size, *, eps=1e-5):
    """Plain-JAX reference matching the PyTorch forward (NCHW conv + LayerNorm)."""
    ph, pw = patch_size
    x_nchw = jnp.transpose(x, (0, 3, 1, 2))
    y = jax.lax.conv_general_dilated(
        x_nchw, conv_w, window_strides=(ph, pw), padding="VALID",
        dimension_numbers=("NCHW", "OIHW", "NCHW"))
    y = y + conv_b.reshape(1, -1, 1, 1)
    y = jnp.transpose(y, (0, 2, 3, 1))             # (B, Hp, Wp, E)
    B, Hp, Wp, E = y.shape
    y = y.reshape(B, Hp * Wp, E)
    mean = jnp.mean(y, axis=-1, keepdims=True)
    var = jnp.mean((y - mean) ** 2, axis=-1, keepdims=True)
    y = (y - mean) / jnp.sqrt(var + eps) * ln_w + ln_b
    return y.reshape(B, Hp, Wp, E)


if __name__ == "__main__":
    # Small config consistent with the module:
    #   img_size=(16,16), patch_size=(4,4), in_chans=4, embed_dim=32, batch=2
    B, H, W, C = 2, 16, 16, 4
    patch_size = (4, 4)
    E = 32

    key = jax.random.PRNGKey(0)
    kx, kw, kb = jax.random.split(key, 3)

    x = jax.random.normal(kx, (B, H, W, C), dtype=jnp.float32)
    conv_w = jax.random.normal(kw, (E, C, patch_size[0], patch_size[1]),
                               dtype=jnp.float32) * 0.05
    conv_b = jax.random.normal(kb, (E,), dtype=jnp.float32) * 0.05
    ln_w = jnp.ones((E,), dtype=jnp.float32)      # LayerNorm default init
    ln_b = jnp.zeros((E,), dtype=jnp.float32)

    fn = jax.jit(functools.partial(patch_embed_pallas, patch_size=patch_size))
    out = jax.block_until_ready(fn(x, conv_w, conv_b, ln_w, ln_b))

    ref = patch_embed_reference(x, conv_w, conv_b, ln_w, ln_b, patch_size)
    assert out.shape == (B, H // patch_size[0], W // patch_size[1], E), out.shape
    # bf16 MXU inputs -> relaxed tolerance vs the f32 reference.
    max_err = float(jnp.max(jnp.abs(out - ref)))
    assert jnp.allclose(out, ref, atol=2e-2, rtol=2e-2), max_err

    print("KERNEL_OK")
</pallas_src>

<mosaic_0001>
module attributes {stable_mosaic.version = 11 : i64} {
  func.func @_patch_embed_kernel(%arg0: i32, %arg1: memref<32x64xbf16, #tpu.memory_space<vmem>>, %arg2: memref<64x32xbf16, #tpu.memory_space<vmem>>, %arg3: memref<1x32xf32, #tpu.memory_space<vmem>>, %arg4: memref<1x32xf32, #tpu.memory_space<vmem>>, %arg5: memref<1x32xf32, #tpu.memory_space<vmem>>, %arg6: memref<32x32xf32, #tpu.memory_space<vmem>>) attributes {dimension_semantics = [#tpu.dimension_semantics<parallel>], iteration_bounds = array<i64: 1>, scalar_prefetch = 0 : i64, scratch_operands = 0 : i64, tpu.core_type = #tpu.core_type<tc>, window_params = [{transform_indices = @transform_0, window_bounds = array<i64: 32, 64>}, {pipeline_mode = #tpu.pipeline_mode<synchronous>, transform_indices = @transform_1, window_bounds = array<i64: 64, 32>}, {pipeline_mode = #tpu.pipeline_mode<synchronous>, transform_indices = @transform_2, window_bounds = array<i64: 1, 32>}, {pipeline_mode = #tpu.pipeline_mode<synchronous>, transform_indices = @transform_3, window_bounds = array<i64: 1, 32>}, {pipeline_mode = #tpu.pipeline_mode<synchronous>, transform_indices = @transform_4, window_bounds = array<i64: 1, 32>}, {transform_indices = @transform_5, window_bounds = array<i64: 32, 32>}]} {
    %c0 = arith.constant 0 : index
    %c0_0 = arith.constant 0 : index
    %0 = vector.load %arg1[%c0, %c0_0] : memref<32x64xbf16, #tpu.memory_space<vmem>>, vector<32x64xbf16>
    %c0_1 = arith.constant 0 : index
    %c0_2 = arith.constant 0 : index
    %1 = vector.load %arg2[%c0_1, %c0_2] : memref<64x32xbf16, #tpu.memory_space<vmem>>, vector<64x32xbf16>
    %cst = arith.constant dense<0.000000e+00> : vector<32x32xf32>
    %2 = tpu.matmul %0, %1, %cst {dimension_numbers = #tpu.dot_dimension_numbers<[1], [0], [0], [1], [0, 0, 1, 1], [], []>} : vector<32x64xbf16>, vector<64x32xbf16>, vector<32x32xf32> -> vector<32x32xf32>
    %c0_3 = arith.constant 0 : index
    %c0_4 = arith.constant 0 : index
    %3 = vector.load %arg3[%c0_3, %c0_4] : memref<1x32xf32, #tpu.memory_space<vmem>>, vector<1x32xf32>
    %4 = vector.broadcast %3 : vector<1x32xf32> to vector<32x32xf32>
    %5 = arith.addf %2, %4 : vector<32x32xf32>
    %cst_5 = arith.constant dense<0.000000e+00> : vector<32xf32>
    %6 = vector.multi_reduction <add>, %5, %cst_5 [1] : vector<32x32xf32> to vector<32xf32>
    %7 = vector.shape_cast %6 : vector<32xf32> to vector<32x1xf32>
    %cst_6 = arith.constant 3.125000e-02 : f32
    %8 = vector.broadcast %cst_6 : f32 to vector<32x1xf32>
    %9 = arith.mulf %7, %8 : vector<32x1xf32>
    %10 = vector.broadcast %9 : vector<32x1xf32> to vector<32x32xf32>
    %11 = arith.subf %5, %10 : vector<32x32xf32>
    %12 = arith.mulf %11, %11 : vector<32x32xf32>
    %cst_7 = arith.constant dense<0.000000e+00> : vector<32xf32>
    %13 = vector.multi_reduction <add>, %12, %cst_7 [1] : vector<32x32xf32> to vector<32xf32>
    %14 = vector.shape_cast %13 : vector<32xf32> to vector<32x1xf32>
    %cst_8 = arith.constant 3.125000e-02 : f32
    %15 = vector.broadcast %cst_8 : f32 to vector<32x1xf32>
    %16 = arith.mulf %14, %15 : vector<32x1xf32>
    %cst_9 = arith.constant 9.99999974E-6 : f32
    %17 = vector.broadcast %cst_9 : f32 to vector<32x1xf32>
    %18 = arith.addf %16, %17 : vector<32x1xf32>
    %19 = math.rsqrt %18 : vector<32x1xf32>
    %20 = vector.broadcast %19 : vector<32x1xf32> to vector<32x32xf32>
    %21 = arith.mulf %11, %20 : vector<32x32xf32>
    %c0_10 = arith.constant 0 : index
    %c0_11 = arith.constant 0 : index
    %22 = vector.load %arg4[%c0_10, %c0_11] : memref<1x32xf32, #tpu.memory_space<vmem>>, vector<1x32xf32>
    %23 = vector.broadcast %22 : vector<1x32xf32> to vector<32x32xf32>
    %24 = arith.mulf %21, %23 : vector<32x32xf32>
    %c0_12 = arith.constant 0 : index
    %c0_13 = arith.constant 0 : index
    %25 = vector.load %arg5[%c0_12, %c0_13] : memref<1x32xf32, #tpu.memory_space<vmem>>, vector<1x32xf32>
    %26 = vector.broadcast %25 : vector<1x32xf32> to vector<32x32xf32>
    %27 = arith.addf %24, %26 : vector<32x32xf32>
    %c0_14 = arith.constant 0 : index
    %c0_15 = arith.constant 0 : index
    %28 = vector.load %arg6[%c0_14, %c0_15] : memref<32x32xf32, #tpu.memory_space<vmem>>, vector<32x32xf32>
    tpu.vector_store %arg6[%c0_14, %c0_15], %27 {strides = array<i32>} : memref<32x32xf32, #tpu.memory_space<vmem>>, vector<32x32xf32>,
    return
  }
  func.func @transform_0(%arg0: i32) -> (i32, i32) {
    %c0_i32 = arith.constant 0 : i32
    %c0_i32_0 = arith.constant 0 : i32
    return %arg0, %c0_i32 : i32, i32
  }
  func.func @transform_1(%arg0: i32) -> (i32, i32) {
    %c0_i32 = arith.constant 0 : i32
    %c0_i32_0 = arith.constant 0 : i32
    %c0_i32_1 = arith.constant 0 : i32
    return %c0_i32, %c0_i32_0 : i32, i32
  }
  func.func @transform_2(%arg0: i32) -> (i32, i32) {
    %c0_i32 = arith.constant 0 : i32
    %c0_i32_0 = arith.constant 0 : i32
    %c0_i32_1 = arith.constant 0 : i32
    return %c0_i32, %c0_i32_0 : i32, i32
  }
  func.func @transform_3(%arg0: i32) -> (i32, i32) {
    %c0_i32 = arith.constant 0 : i32
    %c0_i32_0 = arith.constant 0 : i32
    %c0_i32_1 = arith.constant 0 : i32
    return %c0_i32, %c0_i32_0 : i32, i32
  }
  func.func @transform_4(%arg0: i32) -> (i32, i32) {
    %c0_i32 = arith.constant 0 : i32
    %c0_i32_0 = arith.constant 0 : i32
    %c0_i32_1 = arith.constant 0 : i32
    return %c0_i32, %c0_i32_0 : i32, i32
  }
  func.func @transform_5(%arg0: i32) -> (i32, i32) {
    %c0_i32 = arith.constant 0 : i32
    %c0_i32_0 = arith.constant 0 : i32
    return %arg0, %c0_i32 : i32, i32
  }
}

</mosaic_0001>

<bundles_post_ra>
// kernel: patch_embed_pallas.1
= control target key start
LH: loop header
LB: loop body
LE: loop exit
PB: predicated region body
PF: predicated region fallthrough
CT: control target
= control target key end

     0   :  { %vm75_vm0 = vcmask 523264   ;;  %s369_s0 = inlined_call_operand.vmem [shape: bf16[32,64], index: 0, kind: input, shape index: {}]   ;;  %s370_s1 = inlined_call_operand.vmem [shape: bf16[64,32], index: 1, kind: input, shape index: {}]   ;;  %s371_s2 = inlined_call_operand.vmem [shape: f32[1,32], index: 2, kind: input, shape index: {}]   ;;  %s372_s3 = inlined_call_operand.vmem [shape: f32[1,32], index: 3, kind: input, shape index: {}]   ;;  %s373_s4 = inlined_call_operand.vmem [shape: f32[1,32], index: 4, kind: input, shape index: {}]   ;;  %s374_s5 = inlined_call_operand.hbm [shape: f32[32,32], index: 5, kind: output, shape index: {}]  }
   0x1   :  { %v258_v0 = vld [vmem:[%s370_s1 + $0x18] sm:$0xff]   ;;  %v259_v1 = vld [vmem:[%s370_s1 + $0x10] sm:$0xff]   ;;  %v260_v2 = vld [vmem:[%s370_s1 + $0x8] sm:$0xff]  }
   0x2   :  { %243 = vmatprep.subr.bf16.mxu0 %v258_v0  ;;  %v262_v3 = vld [vmem:[%s369_s0] sm:$0xff]  }
   0x3   :  { %244 = vmatpush3.bf16.msra.mxu0 %v258_v0  ;;  %251 = vmatprep.mubr.msk.bf16.mxu0 %vm75_vm0, %v262_v3 }
   0x4   :  { %245 = vmatprep.subr.bf16.mxu0 %v259_v1 }
   0x5   :  { %10 = vsyncpa [#allocation3], 0  ;;  %v261_v4 = vld [vmem:[%s370_s1] sm:$0xff]   ;;  %v263_v5 = vld [vmem:[%s369_s0 + $0x8] sm:$0xff]   ;;  %vm131_vm1 = vcmask 261120  }
   0x6   :  { %v226_v6 = vld [vmem:[%s371_s2] ss:$0 sm:$0xff] }
   0x7   :  { %246 = vmatpush3.bf16.msra.mxu0 %v259_v1  ;;  %v235_v52 = vld [vmem:[%s372_s3] ss:$0 sm:$0xff]  ;;  %s294_s3 = smov [#allocation2]  }
   0x8   :  { %247 = vmatprep.subr.bf16.mxu0 %v260_v2  ;;  %v236_v54 = vld [vmem:[%s373_s4] ss:$0 sm:$0xff]  ;;  %s215_s8 = sshll.u32 %s294_s3, 4  ;;  %s216_s8 = int_to_ptr.vmem [resolvable:$true] %s215_s8 }
   0x9   :  { %s272_s4 = scalar_lea.vmem %s216_s8, 512  ;;  %p277_p1 = scmp.lt.s32.totalorder %s216_s8, %s216_s8 }
   0xa   :  { %p273_p0 = scmp.ne.s32.totalorder %s216_s8, %s272_s4  ;;  %p278_p2 = scmp.lt.s32.totalorder %s272_s4, %s272_s4 }
   0xb   :  { %248 = vmatpush3.bf16.msra.mxu0 %v260_v2 }
   0xc   :  { %249 = vmatprep.subr.bf16.mxu0 %v261_v4  ;;  %p279_p3 = por %p278_p2, %p277_p1 }
   0xe   :  { %p280_p4 = pnand %p279_p3, %p273_p0 }
   0xf   :  { %250 = vmatpush3.bf16.msra.mxu0 %v261_v4 }
  0x12   :  { %252 = vmatmul.mubr.msk.bf16.vlgmr.msra.gmra.mxu0 %vm75_vm0, %v263_v5 }
  0xd2   :  { %v253_v7 = vpop.f32.mrf.mxu0 }
  0xd3   :  { %v125_v8 = vadd.f32 %v253_v7, %v226_v6 }
  0xd4   :  { %v116_v9 = vpop.f32.mrf.mxu0 }
  0xd5   :  { %v117_v10 = vadd.f32 %v226_v6, %v116_v9  ;;  %v138_v11 = vsel %vm131_vm1, %v125_v8, 0.0 }
  0xd6   :  { %139 = vadd.xlane.f32.xlu1 %v138_v11  ;;  %v254_v12 = vpop.f32.mrf.mxu0 }
  0xd7   :  { %v128_v13 = vadd.f32 %v254_v12, %v226_v6  ;;  %v132_v14 = vsel %vm131_vm1, %v117_v10, 0.0 }
  0xd8   :  { %v119_v15 = vpop.f32.mrf.mxu0  ;;  %133 = vadd.xlane.f32.xlu0 %v132_v14 }
  0xd9   :  { %v120_v16 = vadd.f32 %v226_v6, %v119_v15  ;;  %v141_v17 = vsel %vm131_vm1, %v128_v13, 0.0 }
  0xda   :  { %142 = vadd.xlane.f32.xlu1 %v141_v17 }
  0xdb   :  { %v135_v18 = vsel %vm131_vm1, %v120_v16, 0.0 }
  0xdc   :  { %136 = vadd.xlane.f32.xlu0 %v135_v18 }
 0x15f   :  { %v140_v19 = vpop.xlane.xlu1 %139 }
 0x160   :  { %v146_v20 = vmul.f32 0.03125, %v140_v19 }
 0x161   :  { %v134_v21 = vpop.xlane.xlu0 %133 }
 0x162   :  { %v144_v22 = vmul.f32 0.03125, %v134_v21  ;;  %v150_v24 = vsub.f32 %v125_v8, %v146_v20 }
 0x163   :  { %v143_v23 = vpop.xlane.xlu1 %142 }
 0x164   :  { %v148_v25 = vsub.f32 %v117_v10, %v144_v22  ;;  %v147_v26 = vmul.f32 0.03125, %v143_v23  ;;  %v154_v33 = vmul.f32 %v150_v24, %v150_v24 }
 0x165   :  { %v137_v27 = vpop.xlane.xlu0 %136 }
 0x166   :  { %v145_v28 = vmul.f32 0.03125, %v137_v27  ;;  %v152_v29 = vmul.f32 %v148_v25, %v148_v25  ;;  %v151_v30 = vsub.f32 %v128_v13, %v147_v26  ;;  %v162_v35 = vsel %vm131_vm1, %v154_v33, 0.0 }
 0x168   :  { %v149_v31 = vsub.f32 %v120_v16, %v145_v28  ;;  %v156_v32 = vsel %vm131_vm1, %v152_v29, 0.0  ;;  %v155_v37 = vmul.f32 %v151_v30, %v151_v30 }
 0x169   :  { %157 = vadd.xlane.f32.xlu0 %v156_v32 }
 0x16a   :  { %v153_v34 = vmul.f32 %v149_v31, %v149_v31  ;;  %v165_v38 = vsel %vm131_vm1, %v155_v37, 0.0 }
 0x16c   :  { %v159_v36 = vsel %vm131_vm1, %v153_v34, 0.0 }
 0x16d   :  { %163 = vadd.xlane.f32.xlu0 %v162_v35  ;;  %160 = vadd.xlane.f32.xlu1 %v159_v36 }
 0x171   :  { %166 = vadd.xlane.f32.xlu1 %v165_v38 }
 0x1f2   :  { %v158_v39 = vpop.xlane.xlu0 %157 }
 0x1f3   :  { %v168_v40 = vmul.f32 0.03125, %v158_v39 }
 0x1f5   :  { %v172_v41 = vadd.f32 1e-05, %v168_v40 }
 0x1f6   :  { %v161_v42 = vpop.xlane.xlu1 %160  ;;  %v164_v43 = vpop.xlane.xlu0 %163 }
 0x1f7   :  { %264 = vrsqrt.f32 %v172_v41  ;;  %v169_v44 = vmul.f32 0.03125, %v161_v42  ;;  %v170_v45 = vmul.f32 0.03125, %v164_v43 }
 0x1f9   :  { %v173_v46 = vadd.f32 1e-05, %v169_v44  ;;  %v174_v47 = vadd.f32 1e-05, %v170_v45 }
 0x1fa   :  { %v167_v48 = vpop.xlane.xlu1 %166 }
 0x1fb   :  { %266 = vrsqrt.f32 %v173_v46  ;;  %v171_v49 = vmul.f32 0.03125, %v167_v48 }
 0x1fc   :  { %268 = vrsqrt.f32 %v174_v47 }
 0x1fd   :  { %v175_v50 = vadd.f32 1e-05, %v171_v49 }
 0x1ff   :  { %270 = vrsqrt.f32 %v175_v50 }
 0x204   :  { %v265_v51 = vpop.eup %264 }
 0x205   :  { %v180_v53 = vmul.f32 %v265_v51, %v148_v25 }
 0x207   :  { %v191_v55 = vmul.f32 %v235_v52, %v180_v53 }
 0x208   :  { %v267_v56 = vpop.eup %266 }
 0x209   :  { %v269_v57 = vpop.eup %268  ;;  %v181_v58 = vmul.f32 %v267_v56, %v149_v31  ;;  %v202_v59 = vadd.f32 %v236_v54, %v191_v55 }
 0x20a   :  { %v182_v60 = vmul.f32 %v269_v57, %v150_v24 }
 0x20b   :  { %v192_v61 = vmul.f32 %v235_v52, %v181_v58  ;;  %206 = vst.msk [vmem:[#allocation2] sm:$0xff] %vm131_vm1, %v202_v59 }
 0x20c   :  { %v271_v62 = vpop.eup %270  ;;  %v193_v63 = vmul.f32 %v235_v52, %v182_v60 }
 0x20d   :  { %v183_v0 = vmul.f32 %v271_v62, %v151_v30  ;;  %v203_v1 = vadd.f32 %v236_v54, %v192_v61 }
 0x20e   :  { %v204_v2 = vadd.f32 %v236_v54, %v193_v63 }
 0x20f   :  { %v194_v3 = vmul.f32 %v235_v52, %v183_v0  ;;  %207 = vst.msk [vmem:[#allocation2 + $0x8] sm:$0xff] %vm131_vm1, %v203_v1 }
 0x210   :  { %208 = vst.msk [vmem:[#allocation2 + $0x10] sm:$0xff] %vm131_vm1, %v204_v2 }
 0x211   :  { %v205_v4 = vadd.f32 %v236_v54, %v194_v3 }
 0x213   :  { %209 = vst.msk [vmem:[#allocation2 + $0x18] sm:$0xff] %vm131_vm1, %v205_v4 }
 0x214   :  { %283 = shalt.err (!%p280_p4)
}
 0x215   :  { %s295_s9 = smov 128   ;;  %s296_s10 = smov 8  }
 0x216   :  { %221 = dma.vmem_to_hbm [thread:$0]  %s216_s8, 512, %s374_s5, [#allocation3], %s295_s9, %s295_s9, %s296_s10  }
 0x217   :  { %292 = dma.done.wait [#allocation3], 512  }
 0x218   :  { %293 = vsyncadd [#allocation3], 4294966784 }
 0x219   :  { %225 = vsyncpa [#allocation3], 1 }

</bundles_post_ra>
